<compile_context>
chip_gen: v5e
topology: v5e:2x2
jax: 0.10.0
libtpu: 0.0.40
codegen_flags: <defaults>
</compile_context>

<pallas_src>
import functools

import jax
import jax.numpy as jnp
from jax.experimental import pallas as pl
from jax.experimental.pallas import tpu as pltpu


def _attention_head_kernel(x_ref, wq_ref, wk_ref, wv_ref,
                           bq_ref, bk_ref, bv_ref, mask_ref, o_ref):
    # x_ref:    (1, S, D_in)       one batch element
    # w*_ref:   (D_in, D_out)      pre-transposed weights (resident in VMEM)
    # b*_ref:   (1, D_out)
    # mask_ref: (1, 1, S)          int32, 0 = masked key position
    # o_ref:    (1, S, D_out)
    x = x_ref[0]                                            # (S, D_in)

    # Q/K/V projections: Y = X @ W + b, fp32 accumulation on the MXU.
    q = jnp.dot(x, wq_ref[...], preferred_element_type=jnp.float32) + bq_ref[...]
    k = jnp.dot(x, wk_ref[...], preferred_element_type=jnp.float32) + bk_ref[...]
    v = jnp.dot(x, wv_ref[...], preferred_element_type=jnp.float32) + bv_ref[...]

    # PyTorch: scale = query.size(1) ** 0.5  ==  sqrt(seq_len)
    seq_len = x.shape[0]
    inv_scale = 1.0 / (float(seq_len) ** 0.5)

    # scores = Q @ K^T / scale  -- contract on the feature axis (no explicit
    # transpose of K materialized in VMEM).
    scores = jax.lax.dot_general(
        q, k, (((1,), (1,)), ((), ())),
        preferred_element_type=jnp.float32) * inv_scale      # (S, S)

    # masked_fill(attention_mask[:, None, :] == 0, -1e9)
    mask = mask_ref[0]                                       # (1, S) -> broadcast over rows
    scores = jnp.where(mask == 0, jnp.float32(-1.0e9), scores)

    # numerically-stable softmax over the key axis
    m = jnp.max(scores, axis=-1, keepdims=True)
    e = jnp.exp(scores - m)
    attn = e / jnp.sum(e, axis=-1, keepdims=True)

    # context = attn @ V
    ctx = jnp.dot(attn, v, preferred_element_type=jnp.float32)
    o_ref[0] = ctx.astype(o_ref.dtype)


def attention_head_forward(params, x, attention_mask):
    """AttentionHead.forward: x (B, S, D_in), attention_mask (B, S) -> (B, S, D_out)."""
    wq, bq, wk, bk, wv, bv = params
    B, S, D_in = x.shape
    D_out = wq.shape[1]
    mask3 = attention_mask.reshape(B, 1, S).astype(jnp.int32)

    # advisory cost hint for the XLA scheduler
    flops = B * (3 * 2 * S * D_in * D_out      # Q/K/V projections
                 + 2 * S * S * D_out           # Q @ K^T
                 + 2 * S * S * D_out)          # attn @ V
    bytes_accessed = 4 * (B * S * D_in                     # X
                          + 3 * (D_in * D_out + D_out)     # weights + biases
                          + B * S                          # mask
                          + B * S * D_out)                 # output
    cost = pl.CostEstimate(flops=flops,
                           transcendentals=B * S * S,      # exp in softmax
                           bytes_accessed=bytes_accessed)

    return pl.pallas_call(
        _attention_head_kernel,
        out_shape=jax.ShapeDtypeStruct((B, S, D_out), x.dtype),
        grid_spec=pltpu.PrefetchScalarGridSpec(
            num_scalar_prefetch=0,
            grid=(B,),
            in_specs=[
                pl.BlockSpec((1, S, D_in), lambda b: (b, 0, 0)),   # X (per batch)
                pl.BlockSpec((D_in, D_out), lambda b: (0, 0)),     # Wq (resident)
                pl.BlockSpec((D_in, D_out), lambda b: (0, 0)),     # Wk (resident)
                pl.BlockSpec((D_in, D_out), lambda b: (0, 0)),     # Wv (resident)
                pl.BlockSpec((1, D_out), lambda b: (0, 0)),        # bq
                pl.BlockSpec((1, D_out), lambda b: (0, 0)),        # bk
                pl.BlockSpec((1, D_out), lambda b: (0, 0)),        # bv
                pl.BlockSpec((1, 1, S), lambda b: (b, 0, 0)),      # mask (per batch)
            ],
            out_specs=pl.BlockSpec((1, S, D_out), lambda b: (b, 0, 0)),
        ),
        compiler_params=pltpu.CompilerParams(
            dimension_semantics=("parallel",)),
        cost_estimate=cost,
    )(x, wq, wk, wv, bq, bk, bv, mask3)
    # TODO(synk): for long sequences, add a query-tile grid axis (and K/V
    # streaming / online softmax) so the (S, S) score tile stays within VMEM.


def init_attention_head_params(key, dim_inp, dim_out):
    """PyTorch nn.Linear-style init, but weights stored pre-transposed (D_in, D_out)."""
    bound = 1.0 / (dim_inp ** 0.5)
    kq_w, kq_b, kk_w, kk_b, kv_w, kv_b = jax.random.split(key, 6)
    wq = jax.random.uniform(kq_w, (dim_inp, dim_out), jnp.float32, -bound, bound)
    bq = jax.random.uniform(kq_b, (1, dim_out), jnp.float32, -bound, bound)
    wk = jax.random.uniform(kk_w, (dim_inp, dim_out), jnp.float32, -bound, bound)
    bk = jax.random.uniform(kk_b, (1, dim_out), jnp.float32, -bound, bound)
    wv = jax.random.uniform(kv_w, (dim_inp, dim_out), jnp.float32, -bound, bound)
    bv = jax.random.uniform(kv_b, (1, dim_out), jnp.float32, -bound, bound)
    return (wq, bq, wk, bk, wv, bv)


if __name__ == "__main__":
    dim_inp, dim_out = 32, 16          # AttentionHead(dim_inp=32, dim_out=16)
    batch, seq = 2, 8

    key = jax.random.PRNGKey(0)
    key, kx = jax.random.split(key)
    x = jax.random.normal(kx, (batch, seq, dim_inp), jnp.float32)
    # deterministic mask: last two key positions are padding (== 0)
    attention_mask = jnp.concatenate(
        [jnp.ones((batch, seq - 2), jnp.int32),
         jnp.zeros((batch, 2), jnp.int32)], axis=1)

    params = init_attention_head_params(key, dim_inp, dim_out)

    fwd = jax.jit(functools.partial(attention_head_forward, params))
    out = jax.block_until_ready(fwd(x, attention_mask))

    # Pure-JAX reference matching the PyTorch forward exactly.
    wq, bq, wk, bk, wv, bv = params
    q = x @ wq + bq
    k = x @ wk + bk
    v = x @ wv + bv
    scale = float(seq) ** 0.5          # query.size(1) ** 0.5 in PyTorch
    scores = jnp.einsum('bqd,bkd->bqk', q, k) / scale
    scores = jnp.where(attention_mask[:, None, :] == 0, -1.0e9, scores)
    attn = jax.nn.softmax(scores, axis=-1)
    ref = jnp.einsum('bqk,bkd->bqd', attn, v)

    assert out.shape == (batch, seq, dim_out)
    assert jnp.allclose(out, ref, atol=1e-5, rtol=1e-5)

    print("KERNEL_OK")
</pallas_src>

<mosaic_0001>
module attributes {stable_mosaic.version = 11 : i64} {
  func.func @_attention_head_kernel(%arg0: i32, %arg1: memref<1x8x32xf32, #tpu.memory_space<vmem>>, %arg2: memref<32x16xf32, #tpu.memory_space<vmem>>, %arg3: memref<32x16xf32, #tpu.memory_space<vmem>>, %arg4: memref<32x16xf32, #tpu.memory_space<vmem>>, %arg5: memref<1x16xf32, #tpu.memory_space<vmem>>, %arg6: memref<1x16xf32, #tpu.memory_space<vmem>>, %arg7: memref<1x16xf32, #tpu.memory_space<vmem>>, %arg8: memref<1x1x8xi32, #tpu.memory_space<vmem>>, %arg9: memref<1x8x16xf32, #tpu.memory_space<vmem>>) attributes {dimension_semantics = [#tpu.dimension_semantics<parallel>], iteration_bounds = array<i64: 2>, scalar_prefetch = 0 : i64, scratch_operands = 0 : i64, tpu.core_type = #tpu.core_type<tc>, window_params = [{transform_indices = @transform_0, window_bounds = array<i64: 1, 8, 32>}, {pipeline_mode = #tpu.pipeline_mode<synchronous>, transform_indices = @transform_1, window_bounds = array<i64: 32, 16>}, {pipeline_mode = #tpu.pipeline_mode<synchronous>, transform_indices = @transform_2, window_bounds = array<i64: 32, 16>}, {pipeline_mode = #tpu.pipeline_mode<synchronous>, transform_indices = @transform_3, window_bounds = array<i64: 32, 16>}, {pipeline_mode = #tpu.pipeline_mode<synchronous>, transform_indices = @transform_4, window_bounds = array<i64: 1, 16>}, {pipeline_mode = #tpu.pipeline_mode<synchronous>, transform_indices = @transform_5, window_bounds = array<i64: 1, 16>}, {pipeline_mode = #tpu.pipeline_mode<synchronous>, transform_indices = @transform_6, window_bounds = array<i64: 1, 16>}, {transform_indices = @transform_7, window_bounds = array<i64: 1, 1, 8>}, {transform_indices = @transform_8, window_bounds = array<i64: 1, 8, 16>}]} {
    %c0 = arith.constant 0 : index
    %c0_0 = arith.constant 0 : index
    %c0_1 = arith.constant 0 : index
    %0 = vector.load %arg1[%c0, %c0_0, %c0_1] : memref<1x8x32xf32, #tpu.memory_space<vmem>>, vector<1x8x32xf32>
    %1 = vector.shape_cast %0 : vector<1x8x32xf32> to vector<8x32xf32>
    %c0_2 = arith.constant 0 : index
    %c0_3 = arith.constant 0 : index
    %2 = vector.load %arg2[%c0_2, %c0_3] : memref<32x16xf32, #tpu.memory_space<vmem>>, vector<32x16xf32>
    %cst = arith.constant dense<0.000000e+00> : vector<8x16xf32>
    %3 = tpu.matmul %1, %2, %cst {dimension_numbers = #tpu.dot_dimension_numbers<[1], [0], [0], [1], [0, 0, 1, 1], [], []>} : vector<8x32xf32>, vector<32x16xf32>, vector<8x16xf32> -> vector<8x16xf32>
    %c0_4 = arith.constant 0 : index
    %c0_5 = arith.constant 0 : index
    %4 = vector.load %arg5[%c0_4, %c0_5] : memref<1x16xf32, #tpu.memory_space<vmem>>, vector<1x16xf32>
    %5 = vector.broadcast %4 : vector<1x16xf32> to vector<8x16xf32>
    %6 = arith.addf %3, %5 : vector<8x16xf32>
    %c0_6 = arith.constant 0 : index
    %c0_7 = arith.constant 0 : index
    %7 = vector.load %arg3[%c0_6, %c0_7] : memref<32x16xf32, #tpu.memory_space<vmem>>, vector<32x16xf32>
    %cst_8 = arith.constant dense<0.000000e+00> : vector<8x16xf32>
    %8 = tpu.matmul %1, %7, %cst_8 {dimension_numbers = #tpu.dot_dimension_numbers<[1], [0], [0], [1], [0, 0, 1, 1], [], []>} : vector<8x32xf32>, vector<32x16xf32>, vector<8x16xf32> -> vector<8x16xf32>
    %c0_9 = arith.constant 0 : index
    %c0_10 = arith.constant 0 : index
    %9 = vector.load %arg6[%c0_9, %c0_10] : memref<1x16xf32, #tpu.memory_space<vmem>>, vector<1x16xf32>
    %10 = vector.broadcast %9 : vector<1x16xf32> to vector<8x16xf32>
    %11 = arith.addf %8, %10 : vector<8x16xf32>
    %c0_11 = arith.constant 0 : index
    %c0_12 = arith.constant 0 : index
    %12 = vector.load %arg4[%c0_11, %c0_12] : memref<32x16xf32, #tpu.memory_space<vmem>>, vector<32x16xf32>
    %cst_13 = arith.constant dense<0.000000e+00> : vector<8x16xf32>
    %13 = tpu.matmul %1, %12, %cst_13 {dimension_numbers = #tpu.dot_dimension_numbers<[1], [0], [0], [1], [0, 0, 1, 1], [], []>} : vector<8x32xf32>, vector<32x16xf32>, vector<8x16xf32> -> vector<8x16xf32>
    %c0_14 = arith.constant 0 : index
    %c0_15 = arith.constant 0 : index
    %14 = vector.load %arg7[%c0_14, %c0_15] : memref<1x16xf32, #tpu.memory_space<vmem>>, vector<1x16xf32>
    %15 = vector.broadcast %14 : vector<1x16xf32> to vector<8x16xf32>
    %16 = arith.addf %13, %15 : vector<8x16xf32>
    %cst_16 = arith.constant dense<0.000000e+00> : vector<8x8xf32>
    %17 = tpu.matmul %6, %11, %cst_16 {dimension_numbers = #tpu.dot_dimension_numbers<[1], [1], [0], [0], [0, 0, 1, 0], [], []>} : vector<8x16xf32>, vector<8x16xf32>, vector<8x8xf32> -> vector<8x8xf32>
    %cst_17 = arith.constant 0.353553385 : f32
    %18 = vector.broadcast %cst_17 : f32 to vector<8x8xf32>
    %19 = arith.mulf %17, %18 : vector<8x8xf32>
    %c0_18 = arith.constant 0 : index
    %c0_19 = arith.constant 0 : index
    %c0_20 = arith.constant 0 : index
    %20 = vector.load %arg8[%c0_18, %c0_19, %c0_20] : memref<1x1x8xi32, #tpu.memory_space<vmem>>, vector<1x1x8xi32>
    %21 = vector.shape_cast %20 : vector<1x1x8xi32> to vector<1x8xi32>
    %c0_i32 = arith.constant 0 : i32
    %22 = vector.broadcast %c0_i32 : i32 to vector<1x8xi32>
    %23 = arith.cmpi eq, %21, %22 : vector<1x8xi32>
    %cst_21 = arith.constant -1.000000e+09 : f32
    %24 = vector.shape_cast %23 : vector<1x8xi1> to vector<1x8xi1>
    %25 = vector.broadcast %24 : vector<1x8xi1> to vector<8x8xi1>
    %26 = vector.broadcast %cst_21 : f32 to vector<8x8xf32>
    %27 = arith.select %25, %26, %19 : vector<8x8xi1>, vector<8x8xf32>
    %cst_22 = arith.constant dense<0xFF800000> : vector<8xf32>
    %28 = vector.multi_reduction <maximumf>, %27, %cst_22 [1] : vector<8x8xf32> to vector<8xf32>
    %29 = vector.shape_cast %28 : vector<8xf32> to vector<8x1xf32>
    %30 = vector.broadcast %29 : vector<8x1xf32> to vector<8x8xf32>
    %31 = arith.subf %27, %30 : vector<8x8xf32>
    %32 = math.exp %31 : vector<8x8xf32>
    %cst_23 = arith.constant dense<0.000000e+00> : vector<8xf32>
    %33 = vector.multi_reduction <add>, %32, %cst_23 [1] : vector<8x8xf32> to vector<8xf32>
    %34 = vector.shape_cast %33 : vector<8xf32> to vector<8x1xf32>
    %35 = vector.broadcast %34 : vector<8x1xf32> to vector<8x8xf32>
    %36 = arith.divf %32, %35 : vector<8x8xf32>
    %cst_24 = arith.constant dense<0.000000e+00> : vector<8x16xf32>
    %37 = tpu.matmul %36, %16, %cst_24 {dimension_numbers = #tpu.dot_dimension_numbers<[1], [0], [0], [1], [0, 0, 1, 1], [], []>} : vector<8x8xf32>, vector<8x16xf32>, vector<8x16xf32> -> vector<8x16xf32>
    %c0_25 = arith.constant 0 : index
    %c0_26 = arith.constant 0 : index
    %c0_27 = arith.constant 0 : index
    %38 = vector.load %arg9[%c0_25, %c0_26, %c0_27] : memref<1x8x16xf32, #tpu.memory_space<vmem>>, vector<1x8x16xf32>
    %39 = vector.shape_cast %38 : vector<1x8x16xf32> to vector<8x16xf32>
    %40 = vector.shape_cast %37 : vector<8x16xf32> to vector<1x8x16xf32>
    tpu.vector_store %arg9[%c0_25, %c0_26, %c0_27], %40 {strides = array<i32>} : memref<1x8x16xf32, #tpu.memory_space<vmem>>, vector<1x8x16xf32>,
    return
  }
  func.func @transform_0(%arg0: i32) -> (i32, i32, i32) {
    %c0_i32 = arith.constant 0 : i32
    %c0_i32_0 = arith.constant 0 : i32
    %c0_i32_1 = arith.constant 0 : i32
    return %arg0, %c0_i32, %c0_i32_0 : i32, i32, i32
  }
  func.func @transform_1(%arg0: i32) -> (i32, i32) {
    %c0_i32 = arith.constant 0 : i32
    %c0_i32_0 = arith.constant 0 : i32
    %c0_i32_1 = arith.constant 0 : i32
    return %c0_i32, %c0_i32_0 : i32, i32
  }
  func.func @transform_2(%arg0: i32) -> (i32, i32) {
    %c0_i32 = arith.constant 0 : i32
    %c0_i32_0 = arith.constant 0 : i32
    %c0_i32_1 = arith.constant 0 : i32
    return %c0_i32, %c0_i32_0 : i32, i32
  }
  func.func @transform_3(%arg0: i32) -> (i32, i32) {
    %c0_i32 = arith.constant 0 : i32
    %c0_i32_0 = arith.constant 0 : i32
    %c0_i32_1 = arith.constant 0 : i32
    return %c0_i32, %c0_i32_0 : i32, i32
  }
  func.func @transform_4(%arg0: i32) -> (i32, i32) {
    %c0_i32 = arith.constant 0 : i32
    %c0_i32_0 = arith.constant 0 : i32
    %c0_i32_1 = arith.constant 0 : i32
    return %c0_i32, %c0_i32_0 : i32, i32
  }
  func.func @transform_5(%arg0: i32) -> (i32, i32) {
    %c0_i32 = arith.constant 0 : i32
    %c0_i32_0 = arith.constant 0 : i32
    %c0_i32_1 = arith.constant 0 : i32
    return %c0_i32, %c0_i32_0 : i32, i32
  }
  func.func @transform_6(%arg0: i32) -> (i32, i32) {
    %c0_i32 = arith.constant 0 : i32
    %c0_i32_0 = arith.constant 0 : i32
    %c0_i32_1 = arith.constant 0 : i32
    return %c0_i32, %c0_i32_0 : i32, i32
  }
  func.func @transform_7(%arg0: i32) -> (i32, i32, i32) {
    %c0_i32 = arith.constant 0 : i32
    %c0_i32_0 = arith.constant 0 : i32
    %c0_i32_1 = arith.constant 0 : i32
    return %arg0, %c0_i32, %c0_i32_0 : i32, i32, i32
  }
  func.func @transform_8(%arg0: i32) -> (i32, i32, i32) {
    %c0_i32 = arith.constant 0 : i32
    %c0_i32_0 = arith.constant 0 : i32
    %c0_i32_1 = arith.constant 0 : i32
    return %arg0, %c0_i32, %c0_i32_0 : i32, i32, i32
  }
}

</mosaic_0001>

<bundles_post_ra>
// kernel: attention_head_forward.1
= control target key start
LH: loop header
LB: loop body
LE: loop exit
PB: predicated region body
PF: predicated region fallthrough
CT: control target
= control target key end

     0   :  { %s1332_s0 = inlined_call_operand.hbm [shape: f32[2,8,32], index: 0, kind: input, shape index: {}]   ;;  %s1333_s1 = inlined_call_operand.hbm [shape: f32[32,16], index: 1, kind: input, shape index: {}]   ;;  %s1334_s2 = inlined_call_operand.hbm [shape: f32[32,16], index: 2, kind: input, shape index: {}]   ;;  %s1335_s3 = inlined_call_operand.hbm [shape: f32[32,16], index: 3, kind: input, shape index: {}]   ;;  %s1336_s4 = inlined_call_operand.vmem [shape: f32[1,16], index: 4, kind: input, shape index: {}]   ;;  %s1337_s5 = inlined_call_operand.vmem [shape: f32[1,16], index: 5, kind: input, shape index: {}]   ;;  %s1338_s6 = inlined_call_operand.vmem [shape: f32[1,16], index: 6, kind: input, shape index: {}]   ;;  %s1339_s7 = inlined_call_operand.hbm [shape: s32[2,1,8], index: 7, kind: input, shape index: {}]   ;;  %s1340_s8 = inlined_call_operand.hbm [shape: f32[2,8,16], index: 8, kind: output, shape index: {}]  }
   0x1   :  { %1351 = sst [smem:[#allocation21_spill]] %s1332_s0 }
   0x2   :  { %1352 = sst [smem:[#allocation22_spill]] %s1333_s1 }
   0x3   :  { %1353 = sst [smem:[#allocation23_spill]] %s1334_s2 }
   0x4   :  { %13 = vsyncpa [#allocation3], 0 }
   0x5   :  { %15 = vsyncpa [#allocation3 + $0x1], 0 }
   0x6   :  { %16 = vsyncpa [#allocation6], 0 }
   0x7   :  { %17 = vsyncpa [#allocation9], 0 }
   0x8   :  { %18 = vsyncpa [#allocation4], 0 }
   0x9   :  { %20 = vsyncpa [#allocation4 + $0x1], 0  ;;  %s1105_s27 = smov 0   ;;  %s1107_s28 = smov 0  }
   0xa   :  { %s1109_s29 = smov 0   ;;  %s1111_s30 = smov 0  }
   0xb LB: > { %1354 = sst [smem:[#allocation17_spill]] %s1040_s27  ;;  %s1129_s12 = sadd.s32 4294967295, %s1052_s30   ;;  %s1052_s30 = sphi %s1111_s30, %s1378_s30   ;;  %s1048_s29 = sphi %s1109_s29, %s1382_s29   ;;  %s1044_s28 = sphi %s1107_s28, %s1381_s28   ;;  %s1040_s27 = sphi %s1105_s27, %s1380_s27  }
   0xc   : > { %s1355_s1 = sld [smem:[#allocation22_spill]]  ;;  %p709_p0 = scmp.ge.s32.totalorder %s1052_s30, 1 }
   0xd   : > { %p1350_p1 = scmp.eq.s32.totalorder %s1129_s12, 0  ;;  %p235_p2 = scmp.lt.s32.totalorder %s1052_s30, 3 }
   0xe   : > { %s1054_s14 = smov [#allocation5]   ;;  %s1341_s17 = smov 128  }
   0xf   : > { %p1134_p3 = pnand %p709_p0, %p235_p2  ;;  %s248_s15 = sshll.u32 %s1054_s14, 4  ;;  %s249_s15 = int_to_ptr.vmem [resolvable:$true] %s248_s15 }
  0x10   : > { %s1343_s18 = smov 8   ;;  %s708_s19 = sadd.s32 4294967294, %s1052_s30  }
  0x11   : > { %p750_p4 = pneg %p1134_p3  ;;  %s1154_s20 = sadd.s32 1, %s1052_s30  }
  0x12   : > { %s246_s11 = sshll.u32 %s1355_s1, 4  ;;  %1358 = sst [smem:[#allocation18_spill]] %s1154_s20  ;;  %s247_s11 = int_to_ptr.hbm [resolvable:$true] %s246_s11 }
  0x13   : > { %p1143_p6 = pnand %p750_p4, %p1350_p1  ;;  %s33_s21 = sadd.s32 1, %s1048_s29 }
  0x14   : > { %s30_s22 = ssub.s32 %s1052_s30, %s1154_s20  ;;  %p40_p7 = scmp.ne.s32.totalorder %s1048_s29, %s1044_s28 }
  0x15   : > { %753 = dma.hbm_to_vmem [thread:$0]  (!%p1143_p6), %s247_s11, 512, %s249_s15, [#allocation6], %s1341_s17, %s1341_s17, %s1343_s18  }
  0x16   : > { %p31_p8 = scmp.eq.s32.totalorder %s30_s22, 0  ;;  %p41_p9 = scmp.eq.s32.totalorder %s1052_s30, 0 }
  0x17   : > { %p46_p10 = scmp.ne.s32.totalorder %s1044_s28, %s1040_s27  ;;  %p222_p11 = scmp.eq.s32.totalorder %s1129_s12, 1 }
  0x18   : > { %s1166_s23 = scalar_select %p31_p8, %s1048_s29, %s33_s21  }
  0x19   : > { %p1168_p12 = por %p41_p9, %p40_p7  ;;  %p1174_p13 = por %p1350_p1, %p46_p10 }
  0x1a   : > { %1359 = sst [smem:[#allocation19_spill]] %s1166_s23  ;;  %p1178_p0 = por %p222_p11, %p40_p7 }
  0x1b   : > { %p228_p2 = scmp.eq.s32.totalorder %s708_s19, 1  ;;  %p774_p4 = scmp.lt.s32.totalorder %s1052_s30, 2 }
  0x1c   : > { %s299_s9 = sand.u32 1, %s1052_s30   ;;  %s1348_s11 = sand.u32 1, %s1048_s29  }
  0x1d   : > { %p1184_p5 = por %p228_p2, %p46_p10  ;;  %s715_s14 = sshll.u32 %s1052_s30, 3 }
  0x1e   : > { %s714_s15 = sshll.u32 %s1348_s11, 3  ;;  %s1365_s0 = sld [smem:[#allocation21_spill]] }
  0x1f   : > { %s1363_s10 = scalar_select %p1184_p5, 1, 0 }
  0x20   : > { %s303_s1 = scalar_lea.vmem [#allocation2], %s714_s15  ;;  %p1197_p7 = pnand %p774_p4, %p1168_p12 }
  0x21   : > { %1364 = sst [smem:[#allocation20_spill]] %s1363_s10  ;;  %s311_s23 = sshll.u32 %s303_s1, 4  ;;  %s312_s23 = int_to_ptr.vmem [resolvable:$true] %s311_s23 }
  0x22   : > { %s1367_s2 = sld [smem:[#allocation23_spill]]  ;;  %s1204_s27 = scalar_lea.sflag [#allocation3], %s299_s9 }
  0x23   : > { %p858_p9 = pneg %p1197_p7 }
  0x24   : > { %s307_s17 = scalar_lea.hbm %s1365_s0, %s715_s14  ;;  %s861_s20 = scalar_lea.hbm %s1365_s0, 16 }
  0x25   : > { %s309_s18 = sshll.u32 %s307_s17, 4  ;;  %s310_s18 = int_to_ptr.hbm [resolvable:$true] %s309_s18 }
  0x26   : > { %s854_s14 = sshra.s32 %s310_s18, 4  ;;  %s855_s14 = int_to_ptr.hbm [resolvable:$true] %s854_s14 }
  0x27   : > { %s856_s17 = scalar_lea.hbm %s855_s14, 8  ;;  %p862_p12 = scmp.lt.s32.totalorder %s855_s14, %s1365_s0 }
  0x28   : > { %s260_s11 = sshll.u32 %s1367_s2, 4  ;;  %p857_p8 = scmp.ne.s32.totalorder %s855_s14, %s856_s17  ;;  %s261_s11 = int_to_ptr.hbm [resolvable:$true] %s260_s11 }
  0x29   : > { %p863_p2 = scmp.lt.s32.totalorder %s861_s20, %s856_s17 }
  0x2a   : > { %p859_p10 = pnand %p858_p9, %p857_p8 }
  0x2b   : > { %p864_p4 = por %p863_p2, %p862_p12 }
  0x2c   : > { %p860_p11 = pneg %p859_p10 }
  0x2e   : > { %p865_p1 = pnand %p864_p4, %p860_p11 }
  0x30   : > { %868 = shalt.err (!%p865_p1)
}
  0x31   : > { %763 = dma.hbm_to_vmem [thread:$0]  (!%p1197_p7), %s310_s18, 128, %s312_s23, %s1204_s27  }
  0x32   : > { %s1057_s9 = smov [#allocation7]   ;;  %s274_s24 = sshll.u32 %s1335_s3, 4  ;;  %s275_s24 = int_to_ptr.hbm [resolvable:$true] %s274_s24 }
  0x33   : > { %s262_s21 = sshll.u32 %s1057_s9, 4  ;;  %s1368_s14 = smov 8   ;;  %s263_s21 = int_to_ptr.vmem [resolvable:$true] %s262_s21 }
  0x34   : > { %s1369_s17 = smov 128   ;;  %s1058_s20 = smov [#allocation8]  }
  0x35   : > { %756 = dma.hbm_to_vmem [thread:$0]  (!%p1143_p6), %s261_s11, 512, %s263_s21, [#allocation6], %s1369_s17, %s1369_s17, %s1368_s14  }
  0x36   : > { %s276_s10 = sshll.u32 %s1058_s20, 4  ;;  %s324_s18 = scalar_lea.hbm %s1339_s7, %s1052_s30  ;;  %s277_s10 = int_to_ptr.vmem [resolvable:$true] %s276_s10 }
  0x37   : > { %s326_s23 = sshll.u32 %s324_s18, 4  ;;  %s1370_s9 = sand.u32 1, %s1048_s29   ;;  %s327_s23 = int_to_ptr.hbm [resolvable:$true] %s326_s23 }
  0x38   : > { %759 = dma.hbm_to_vmem [thread:$0]  (!%p1143_p6), %s275_s24, 512, %s277_s10, [#allocation9], %s1369_s17, %s1369_s17, %s1368_s14  }
  0x39   : > { %s321_s22 = scalar_lea.vmem [#allocation10], %s1370_s9  ;;  %s944_s2 = sshra.s32 %s327_s23, 4  ;;  %s945_s2 = int_to_ptr.hbm [resolvable:$true] %s944_s2 }
  0x3a   : > { %s328_s1 = sshll.u32 %s321_s22, 4  ;;  %s946_s11 = scalar_lea.hbm %s945_s2, 1  ;;  %s329_s1 = int_to_ptr.vmem [resolvable:$true] %s328_s1 }
  0x3b   : > { %p947_p1 = scmp.ne.s32.totalorder %s945_s2, %s946_s11  ;;  %s951_s16 = scalar_lea.hbm %s1339_s7, 2 }
  0x3c   : > { %p952_p6 = scmp.lt.s32.totalorder %s945_s2, %s1339_s7  ;;  %p953_p11 = scmp.lt.s32.totalorder %s951_s16, %s946_s11 }
  0x3d   : > { %p949_p8 = pnand %p947_p1, %p858_p9 }
  0x3e   : > { %p954_p12 = por %p953_p11, %p952_p6 }
  0x3f   : > { %p950_p10 = pneg %p949_p8 }
  0x41   : > { %p955_p2 = pnand %p954_p12, %p950_p10 }
  0x43   : > { %958 = shalt.err (!%p955_p2)
}
  0x44   : > { %766 = dma.hbm_to_vmem [thread:$0]  (!%p1197_p7), %s327_s23, 16, %s329_s1, %s1204_s27  }
  0x45   : > { %337 = sbr.rel (%p1134_p3) target bundleno = 757 (0x2f5), region = 52  ;;  %s339_s24 = sand.u32 (!%p1134_p3), 1, %s1129_s12  }
  0x46   : > { %s1255_s14 = sand.u32 (!%p1134_p3), 1, %s1044_s28   ;;  %s340_s17 = scalar_lea.sflag (!%p1134_p3), [#allocation3], %s339_s24 }
  0x47   : > { %s717_s2 = sshll.u32 (!%p1134_p3), %s1255_s14, 3 }
  0x48   : > { %s343_s10 = scalar_lea.vmem (!%p1134_p3), [#allocation2], %s717_s2 }
  0x4a   : > { %1019 = dma.done.wait (%p1174_p13), %s340_s17, 128  }
  0x4b   : > { %1021 = vsyncadd (%p1174_p13), %s340_s17, 4294967168  ;;  %p1371_p7 = scmp.eq.s32.totalorder %s1129_s12, 0 }
  0x4d   : > { %1023 = dma.done.wait (%p1371_p7), [#allocation6], 1024   ;;  %p1372_p3 = pmov %p1371_p7 }
  0x4f   : > { %1025 = vsyncadd (%p1372_p3), [#allocation6], 4294966272  ;;  %p1373_p9 = pmov %p1372_p3 }
  0x50   : > { %p1374_p4 = pmov %p1372_p3 }
  0x51   : > { %1027 = dma.done.wait (%p1373_p9), [#allocation9], 512  }
  0x52   : > { %1029 = vsyncadd (%p1374_p4), [#allocation9], 4294966784  ;;  %s367_s27 = scalar_lea.vmem [#allocation10], %s1255_s14 }
  0x53   : > { %1031 = dma.done.wait (%p1174_p13), %s340_s17, 16  }
  0x54   : > { %1033 = vsyncadd (%p1174_p13), %s340_s17, 4294967280  ;;  %v441_v0 = vld [vmem:[#allocation7 + $0x18] sm:$0xff]  ;;  %v440_v1 = vld [vmem:[#allocation7 + $0x10] sm:$0xff]  ;;  %vm414_vm0 = vcmask 261120   ;;  %vm494_vm1 = vcmask 130048   ;;  %v1059_v17 = vmov 0  }
  0x55   : > { %v409_v2 = vld [vmem:[#allocation5 + $0x18] sm:$0xff]  ;;  %458 = vmatpush.msra.mxu1 %v441_v0  ;;  %v408_v3 = vld [vmem:[#allocation5 + $0x10] sm:$0xff]  ;;  %v439_v4 = vld [vmem:[#allocation7 + $0x8] sm:$0xff]  ;;  %vm528_vm4 = vcmask 64512   ;;  %s729_s22 = sshll.u32 %s1129_s12, 3  ;;  %s404_s21 = scalar_lea.vmem [#allocation11], %s717_s2 }
  0x56   : > { %430 = vmatpush.msra.mxu0 %v409_v2  ;;  %v407_v5 = vld [vmem:[#allocation5 + $0x8] sm:$0xff]  ;;  %v438_v6 = vld [vmem:[#allocation7] sm:$0xff]  ;;  %v405_v8 = vld [vmem:[%s343_s10] sm:$0xff]  ;;  %s588_s0 = scalar_lea.hbm %s1340_s8, %s729_s22  ;;  %s590_s16 = sshll.u32 %s404_s21, 4  ;;  %s591_s16 = int_to_ptr.vmem [resolvable:$true] %s590_s16 }
  0x57   : > { %459 = vmatpush.msra.mxu1 %v440_v1  ;;  %v406_v7 = vld [vmem:[#allocation5] sm:$0xff]  ;;  %v817_v9 = vld [vmem:[%s1337_s5] ss:$0 sm:$0xff]  ;;  %v469_v15 = vld [vmem:[#allocation8 + $0x18] sm:$0xff]  ;;  %s592_s20 = sshll.u32 %s588_s0, 4  ;;  %s578_s15 = scalar_lea.sflag [#allocation4], %s1255_s14  ;;  %s593_s20 = int_to_ptr.hbm [resolvable:$true] %s592_s20 }
  0x58   : > { %431 = vmatpush.msra.mxu0 %v408_v3  ;;  %v818_v10 = vld [vmem:[%s1336_s4] ss:$0 sm:$0xff]  ;;  %486 = vmatpush.msra.mxu2 %v469_v15  ;;  %v467_v25 = vld [vmem:[#allocation8 + $0x8] sm:$0xff]  ;;  %v466_v26 = vld [vmem:[#allocation8] sm:$0xff]  ;;  %s988_s24 = sshra.s32 %s593_s20, 4  ;;  %s989_s24 = int_to_ptr.hbm [resolvable:$true] %s988_s24 }
  0x59   : > { %460 = vmatpush.msra.mxu1 %v439_v4  ;;  %v522_v16 = vld [vmem:[%s367_s27] sm:$0x1]  ;;  %s990_s17 = scalar_lea.hbm %s989_s24, 8  ;;  %s994_s27 = scalar_lea.hbm %s1340_s8, 16 }
  0x5a   : > { %432 = vmatpush.msra.mxu0 %v407_v5  ;;  %vm523_vm2 = vcmp.eq.s32.totalorder %v522_v16, 0  ;;  %v468_v24 = vld [vmem:[#allocation8 + $0x10] sm:$0xff]  ;;  %p991_p13 = scmp.ne.s32.totalorder %s989_s24, %s990_s17  ;;  %p995_p10 = scmp.lt.s32.totalorder %s989_s24, %s1340_s8 }
  0x5b   : > { %461 = vmatpush.msra.mxu1 %v438_v6  ;;  %v524_v18 = vsel %vm523_vm2, 1, %v1059_v17  ;;  %487 = vmatpush.msra.mxu2 %v468_v24  ;;  %v819_v32 = vld [vmem:[%s1338_s6] ss:$0 sm:$0xff]  ;;  %p996_p6 = scmp.lt.s32.totalorder %s994_s27, %s990_s17 }
  0x5c   : > { %433 = vmatpush.msra.mxu0 %v406_v7  ;;  %723 = vmatmul.msk.f32.vlgmr.msra.gmra.mxu1 %vm414_vm0, %v405_v8  ;;  %v525_v19 = vperm.slane %v524_v18, 0  ;;  %p992_p1 = pnand %p991_p13, %p1178_p0 }
  0x5d   : > { %722 = vmatmul.msk.f32.vlgmr.msra.gmra.mxu0 %vm414_vm0, %v405_v8  ;;  %488 = vmatpush.msra.mxu2 %v467_v25  ;;  %p997_p11 = por %p996_p6, %p995_p10 }
  0x5e   : > { %vm526_vm3 = vcmp.eq.s32.totalorder %v525_v19, 1  ;;  %p993_p8 = pneg %p992_p1 }
  0x5f   : > { %489 = vmatpush.msra.mxu2 %v466_v26 }
  0x60   : > { %724 = vmatmul.msk.f32.vlgmr.msra.gmra.mxu2 %vm414_vm0, %v405_v8  ;;  %p998_p12 = pnand %p997_p11, %p993_p8 }
  0xd9   : > { %v463_v11 = vpop.f32.mrf.mxu1 }
  0xda   : > { %v435_v12 = vpop.f32.mrf.mxu0  ;;  %v464_v13 = vadd.f32 %v817_v9, %v463_v11 }
  0xdb   : > { %v436_v14 = vadd.f32 %v818_v10, %v435_v12 }
  0xdc   : > { %725 = vmatpush.xpose.msk.msra.mxu3 %vm494_vm1, %v464_v13 }
  0xdf   : > { %726 = vmatmul.msk.f32.vlgmr.msra.gmra.mxu3 %vm494_vm1, %v436_v14 }
  0xe3   : > { %v491_v33 = vpop.f32.mrf.mxu2 }
  0xe4   : > { %v492_v34 = vadd.f32 %v819_v32, %v491_v33 }
  0xe6   : > { %571 = vmatpush.msrb.mxu3 %v492_v34 }
 0x162   : > { %v518_v20 = vpop.f32.mrf.mxu3 }
 0x163   : > { %v521_v21 = vmul.f32 0.35355338, %v518_v20 }
 0x165   : > { %v527_v22 = vsel %vm526_vm3, -1e+09, %v521_v21 }
 0x166   : > { %v529_v23 = vsel %vm528_vm4, %v527_v22, -inf }
 0x167   : > { %530 = vmax.xlane.f32.xlu0 %v529_v23 }
 0x1da   : > { %v531_v27 = vpop.xlane.xlu0 %530 }
 0x1db   : > { %v532_v28 = vsub.f32 %v527_v22, %v531_v27 }
 0x1dd   : > { %v533_v29 = vmul.f32 1.442695, %v532_v28 }
 0x1df   : > { %820 = vpow2.f32 %v533_v29 }
 0x1e5   : > { %v821_v30 = vpop.eup %820 }
 0x1e6   : > { %v535_v31 = vsel %vm528_vm4, %v821_v30, 0.0 }
 0x1e7   : > { %536 = vadd.xlane.f32.xlu0 %v535_v31 }
 0x25a   : > { %v537_v35 = vpop.xlane.xlu0 %536 }
 0x25b   : > { %822 = vrcp.f32 %v537_v35  ;;  %v549_v39 = vand.u32 2147483648, %v537_v35  ;;  %v547_v41 = vand.u32 2147483647, %v537_v35  ;;  %vm543_vm6 = vweird.f32 %v537_v35 }
 0x25d   : > { %v550_v43 = vor.u32 1.1754944e-38, %v549_v39  ;;  %vm548_vm8 = vcmp.eq.f32.partialorder %v547_v41, 8.507059e+37 }
 0x261   : > { %v823_v36 = vpop.eup %822 }
 0x262   : > { %v539_v37 = vmul.f32 %v823_v36, %v537_v35  ;;  %vm544_vm5 = vweird.f32 %v823_v36 }
 0x263   : > { %vm545_vm7 = vmor %vm543_vm6, %vm544_vm5 }
 0x264   : > { %v540_v38 = vsub.f32 1.0, %v539_v37 }
 0x266   : > { %v541_v40 = vmul.f32 %v823_v36, %v540_v38 }
 0x268   : > { %v542_v42 = vadd.f32 %v823_v36, %v541_v40 }
 0x26a   : > { %v546_v44 = vsel %vm545_vm7, %v823_v36, %v542_v42 }
 0x26b   : > { %v551_v45 = vsel %vm548_vm8, %v550_v43, %v546_v44 }
 0x26c   : > { %v552_v46 = vmul.f32 %v821_v30, %v551_v45 }
 0x26e   : > { %727 = vmatmul.msk.f32.vlgmr.msrb.gmra.mxu3 %vm528_vm4, %v552_v46 }
 0x2f1   : > { %v573_v47 = vpop.f32.mrf.mxu3 }
 0x2f2   : > { %576 = vst.msk [vmem:[%s404_s21] sm:$0xff] %vm494_vm1, %v573_v47 }
 0x2f3   : > { %1001 = shalt.err (!%p998_p12)
}
 0x2f4   : > { %748 = dma.vmem_to_hbm [thread:$0]  (%p1178_p0), %s591_s16, 128, %s593_s20, %s578_s15  }
 0x2f5 PF: > { %s1375_s14 = sld [smem:[#allocation17_spill]]  ;;  %p1377_p2 = scmp.ge.s32.totalorder %s1052_s30, 2 }
 0x2f7   : > { %p768_p7 = pnand %p1377_p2, %p1184_p5 }
 0x2f9   : > { %p769_p3 = pneg %p768_p7 }
 0x2fb   : > { %s604_s19 = sand.u32 1, %s1375_s14  }
 0x2fc   : > { %s605_s18 = scalar_lea.sflag [#allocation4], %s604_s19 }
 0x2fd   : > { %1035 = dma.done.wait (%p769_p3), %s605_s18, 128  }
 0x2fe   : > { %1037 = vsyncadd (%p769_p3), %s605_s18, 4294967168  ;;  %s1378_s30 = sld [smem:[#allocation18_spill]]  ;;  %s1380_s27 = smov %s1044_s28 }
 0x2ff   : > { %s1379_s23 = sld [smem:[#allocation19_spill]]  ;;  %s1381_s28 = smov %s1048_s29 }
 0x304   : > { %p23_p9 = scmp.ge.s32.totalorder %s1378_s30, 4  }
 0x305   : > { %s1382_s29 = smov %s1379_s23 }
 0x306   :  { %25 = sbr.rel (!%p23_p9) target bundleno = 11 (0xb), region = 120 }
 0x30b   :  { %611 = vsyncpa [#allocation3], 1 }
 0x30c   :  { %613 = vsyncpa [#allocation3 + $0x1], 1 }
 0x30d   :  { %614 = vsyncpa [#allocation6], 1 }
 0x30e   :  { %615 = vsyncpa [#allocation9], 1 }
 0x30f   :  { %616 = vsyncpa [#allocation4], 1 }
 0x310   :  { %618 = vsyncpa [#allocation4 + $0x1], 1 }

</bundles_post_ra>
